<compile_context>
chip_gen: v7x
topology: tpu7x:2x2x1
jax: 0.10.0
libtpu: 0.0.40
codegen_flags: <defaults>
</compile_context>

<pallas_src>
import functools

import jax
import jax.numpy as jnp
from jax import lax
from jax.experimental import pallas as pl
from jax.experimental.pallas import tpu as pltpu

LANE = 128   # vreg lane width
SUB = 8      # vreg sublane count

_ENC_TILE_TARGET = 4 << 20    # aim for a multi-MiB bf16 enc tile per buffer
_VMEM_TILE_BUDGET = 24 << 20  # accounted per-step footprint cap (fits v7x 64 MiB VMEM)
_VMEM_LIMIT = 32 << 20        # explicit scoped-VMEM limit (also covers v5e's 16 MiB default)


def _round_up(x, m):
    return ((x + m - 1) // m) * m


# ---------------------------------------------------------------------------
# Kernel
# ---------------------------------------------------------------------------
def _attention_kernel(src_len, dec_ref, enc_ref, we_ref, v_ref, out_ref):
    """One grid step handles one TB-row batch tile.

    dec_ref: (TB, 1, Hp)  f32   precomputed dec @ Wd + bias (padded)
    enc_ref: (TB, S8, Fp) bf16  encoder outputs, S padded only to sublane (8)
    we_ref:  (Fp, Hp)     bf16  encoder half of the W weight
    v_ref:   (1, Hp)      f32
    out_ref: (TB, S8)     f32   softmax over the source axis
    """
    TB, S8, Fp = enc_ref.shape
    Hp = we_ref.shape[1]

    # One lane/sublane-dense MXU matmul for the whole tile: (TB*S8, Fp)@(Fp, Hp).
    enc2d = enc_ref[...].reshape(TB * S8, Fp)
    proj = jnp.dot(enc2d, we_ref[...], preferred_element_type=jnp.float32)
    energy = jnp.tanh(proj.reshape(TB, S8, Hp) + dec_ref[...])       # (TB, S8, Hp) f32

    # scores[b, s] = v . energy[b, s, :]  -- single VPU multiply + XLU lane
    # reduce; no per-row M=1 matmuls, no scratch store->load round-trip.
    v = v_ref[...].reshape(1, 1, Hp)
    scores = jnp.sum(energy * v, axis=-1)                            # (TB, S8) f32

    if src_len != S8:
        # mask the (at most 7) sublane-padding source positions
        lane = lax.broadcasted_iota(jnp.int32, (TB, S8), 1)
        scores = jnp.where(lane < src_len, scores, -1e30)

    m = jnp.max(scores, axis=-1, keepdims=True)
    e = jnp.exp(scores - m)
    denom = jnp.sum(e, axis=-1, keepdims=True)
    out_ref[...] = (e * pl.reciprocal(denom, approx=False)).astype(out_ref.dtype)


# ---------------------------------------------------------------------------
# Tiling / prep (do once, reuse across decoder steps)
# ---------------------------------------------------------------------------
def _choose_tiles(B, S, H):
    Hp = _round_up(H, LANE)
    Fp = _round_up(2 * H, LANE)
    S8 = _round_up(S, SUB)          # enc is the dominant HBM stream: sublane pad only

    enc_row = S8 * Fp * 2           # bf16 enc bytes per batch element
    f32_row = 2 * S8 * Hp * 4       # proj + energy f32 intermediates per element

    def footprint(tb):
        # double-buffered bf16 enc + f32 matmul/tanh temporaries + output buffers
        return 2 * tb * enc_row + tb * f32_row + 2 * tb * S8 * 4

    TB = max(SUB, _round_up(max(_ENC_TILE_TARGET // max(enc_row, 1), 1), SUB))
    TB = min(TB, _round_up(B, SUB))
    while TB > SUB and footprint(TB) > _VMEM_TILE_BUDGET:
        TB -= SUB
    # TODO(synk): if TB == 8 still exceeds the budget (very long S / large H), add an
    # S-axis grid split with a two-pass/online softmax instead of relying on VMEM headroom.

    # v7x megacore: prefer >= 2 grid steps so the "parallel" batch axis can shard
    # across both TensorCores.
    while TB > SUB and _round_up(B, TB) // TB < 2:
        TB = max(SUB, _round_up(TB // 2, SUB))

    Bp = _round_up(B, TB)
    return S8, TB, Bp, Hp, Fp


def prepare_params(W_weight, W_bias, v_weight):
    """One-time weight split / pad / bf16 cast (reuse across decoder steps)."""
    H = W_weight.shape[0]
    assert W_weight.shape == (H, 3 * H)
    Hp = _round_up(H, LANE)
    Fp = _round_up(2 * H, LANE)
    # nn.Linear computes x @ W.T + b; split W by input column: first H columns act
    # on the repeated decoder state, last 2H act on the encoder outputs.
    Wd = W_weight[:, :H].T.astype(jnp.float32)                        # (H, H)
    We = W_weight[:, H:].T                                            # (2H, H)
    we_p = jnp.zeros((Fp, Hp), jnp.bfloat16).at[:2 * H, :H].set(We.astype(jnp.bfloat16))
    v_p = jnp.zeros((1, Hp), jnp.float32).at[0, :H].set(
        v_weight.reshape(H).astype(jnp.float32))
    return {"H": H, "Wd": Wd, "bias": W_bias.astype(jnp.float32),
            "we_p": we_p, "v_p": v_p}


def prepare_encoder(enc_outputs, params):
    """One-time pad + bf16 cast of encoder outputs (reuse across decoder steps)."""
    H = params["H"]
    B, S, F = enc_outputs.shape
    assert F == 2 * H
    S8, TB, Bp, Hp, Fp = _choose_tiles(B, S, H)
    enc_p = jnp.zeros((Bp, S8, Fp), jnp.bfloat16).at[:B, :S, :2 * H].set(
        enc_outputs.astype(jnp.bfloat16))
    return enc_p, (B, S, S8, TB, Bp, Hp, Fp)


# ---------------------------------------------------------------------------
# Per-step attention call
# ---------------------------------------------------------------------------
def attention_step(dec_hidden, enc_prepared, meta, params):
    """dec_hidden (1, B, H) + prepared encoder -> (B, S) attention weights."""
    B, S, S8, TB, Bp, Hp, Fp = meta
    H = params["H"]
    assert dec_hidden.shape == (1, B, H)

    # Hoist the tiny M=B decoder projection (+bias) into plain XLA.
    dec_proj = dec_hidden[0].astype(jnp.float32) @ params["Wd"] + params["bias"]  # (B, H)
    dec_p = jnp.zeros((Bp, 1, Hp), jnp.float32).at[:B, 0, :H].set(dec_proj)

    kernel = functools.partial(_attention_kernel, S)
    out = pl.pallas_call(
        kernel,
        out_shape=jax.ShapeDtypeStruct((Bp, S8), jnp.float32),
        grid=(Bp // TB,),
        in_specs=[
            pl.BlockSpec((TB, 1, Hp), lambda i: (i, 0, 0)),     # dec projection (+bias)
            pl.BlockSpec((TB, S8, Fp), lambda i: (i, 0, 0)),    # enc (bf16)
            pl.BlockSpec((Fp, Hp), lambda i: (0, 0)),           # We  (bf16)
            pl.BlockSpec((1, Hp), lambda i: (0, 0)),            # v
        ],
        out_specs=pl.BlockSpec((TB, S8), lambda i: (i, 0)),
        compiler_params=pltpu.CompilerParams(
            dimension_semantics=("parallel",),
            vmem_limit_bytes=_VMEM_LIMIT,
        ),
    )(dec_p, enc_prepared, params["we_p"], params["v_p"])

    return out[:B, :S]   # strip batch / sublane padding


def attention_forward(dec_hidden, enc_outputs, W_weight, W_bias, v_weight):
    """One-shot convenience wrapper. In a real decoder loop, call prepare_params /
    prepare_encoder once and attention_step per decoding step."""
    params = prepare_params(W_weight, W_bias, v_weight)
    enc_p, meta = prepare_encoder(enc_outputs, params)
    return attention_step(dec_hidden, enc_p, meta, params)


# ---------------------------------------------------------------------------
# Pure-JAX reference (mirrors the PyTorch forward exactly, f32)
# ---------------------------------------------------------------------------
def attention_reference(dec_hidden, enc_outputs, W_weight, W_bias, v_weight):
    S = enc_outputs.shape[1]
    dec = jnp.transpose(dec_hidden, (1, 0, 2))                 # (B, 1, H)
    dec = jnp.tile(dec, (1, S, 1))                             # (B, S, H)
    cat = jnp.concatenate((dec, enc_outputs), axis=2)          # (B, S, 3H)
    energy = jnp.tanh(cat @ W_weight.T + W_bias)               # (B, S, H)
    scores = (energy @ v_weight.T)[..., 0]                     # (B, S)
    return jax.nn.softmax(scores, axis=1)


if __name__ == "__main__":
    B, S, H = 2, 8, 32  # batch, src_len, hidden_dim

    key = jax.random.PRNGKey(0)
    k0, k1, k2, k3, k4 = jax.random.split(key, 5)

    # Deterministic parameters (shapes per nn.Linear(3H, H) and nn.Linear(H, 1)).
    W_weight = jax.random.normal(k0, (H, 3 * H), dtype=jnp.float32) * 0.1
    W_bias = jax.random.normal(k1, (H,), dtype=jnp.float32) * 0.1
    v_weight = jax.random.normal(k2, (1, H), dtype=jnp.float32) * 0.1

    # Example inputs.
    dec_hidden = jax.random.normal(k3, (1, B, H), dtype=jnp.float32)
    enc_outputs = jax.random.normal(k4, (B, S, 2 * H), dtype=jnp.float32)

    out = attention_forward(dec_hidden, enc_outputs, W_weight, W_bias, v_weight)
    out = jax.block_until_ready(out)

    ref = attention_reference(dec_hidden, enc_outputs, W_weight, W_bias, v_weight)
    assert out.shape == (B, S)
    # bf16 enc/We inputs -> slightly looser tolerance than pure f32.
    assert jnp.allclose(out, ref, atol=1e-2, rtol=1e-2), "mismatch vs reference"
    # exact reciprocal -> softmax rows normalize to f32 precision
    assert jnp.allclose(jnp.sum(out, axis=1), jnp.ones((B,)), atol=1e-4)

    print("KERNEL_OK")
</pallas_src>

<mosaic_0001>
module attributes {stable_mosaic.version = 11 : i64} {
  func.func @_attention_kernel(%arg0: i32, %arg1: memref<8x1x128xf32, #tpu.memory_space<vmem>>, %arg2: memref<8x8x128xbf16, #tpu.memory_space<vmem>>, %arg3: memref<128x128xbf16, #tpu.memory_space<vmem>>, %arg4: memref<1x128xf32, #tpu.memory_space<vmem>>, %arg5: memref<8x8xf32, #tpu.memory_space<vmem>>) attributes {dimension_semantics = [#tpu.dimension_semantics<parallel>], iteration_bounds = array<i64: 1>, scalar_prefetch = 0 : i64, scratch_operands = 0 : i64, tpu.core_type = #tpu.core_type<tc>, window_params = [{transform_indices = @transform_0, window_bounds = array<i64: 8, 1, 128>}, {transform_indices = @transform_1, window_bounds = array<i64: 8, 8, 128>}, {pipeline_mode = #tpu.pipeline_mode<synchronous>, transform_indices = @transform_2, window_bounds = array<i64: 128, 128>}, {pipeline_mode = #tpu.pipeline_mode<synchronous>, transform_indices = @transform_3, window_bounds = array<i64: 1, 128>}, {transform_indices = @transform_4, window_bounds = array<i64: 8, 8>}]} {
    %c0 = arith.constant 0 : index
    %c0_0 = arith.constant 0 : index
    %c0_1 = arith.constant 0 : index
    %0 = vector.load %arg2[%c0, %c0_0, %c0_1] : memref<8x8x128xbf16, #tpu.memory_space<vmem>>, vector<8x8x128xbf16>
    %1 = vector.shape_cast %0 : vector<8x8x128xbf16> to vector<64x128xbf16>
    %c0_2 = arith.constant 0 : index
    %c0_3 = arith.constant 0 : index
    %2 = vector.load %arg3[%c0_2, %c0_3] : memref<128x128xbf16, #tpu.memory_space<vmem>>, vector<128x128xbf16>
    %cst = arith.constant dense<0.000000e+00> : vector<64x128xf32>
    %3 = tpu.matmul %1, %2, %cst {dimension_numbers = #tpu.dot_dimension_numbers<[1], [0], [0], [1], [0, 0, 1, 1], [], []>} : vector<64x128xbf16>, vector<128x128xbf16>, vector<64x128xf32> -> vector<64x128xf32>
    %4 = vector.shape_cast %3 : vector<64x128xf32> to vector<8x8x128xf32>
    %c0_4 = arith.constant 0 : index
    %c0_5 = arith.constant 0 : index
    %c0_6 = arith.constant 0 : index
    %5 = vector.load %arg1[%c0_4, %c0_5, %c0_6] : memref<8x1x128xf32, #tpu.memory_space<vmem>>, vector<8x1x128xf32>
    %6 = vector.broadcast %5 : vector<8x1x128xf32> to vector<8x8x128xf32>
    %7 = arith.addf %4, %6 : vector<8x8x128xf32>
    %8 = math.tanh %7 : vector<8x8x128xf32>
    %c0_7 = arith.constant 0 : index
    %c0_8 = arith.constant 0 : index
    %9 = vector.load %arg4[%c0_7, %c0_8] : memref<1x128xf32, #tpu.memory_space<vmem>>, vector<1x128xf32>
    %10 = vector.shape_cast %9 : vector<1x128xf32> to vector<1x1x128xf32>
    %11 = vector.broadcast %10 : vector<1x1x128xf32> to vector<8x8x128xf32>
    %12 = arith.mulf %8, %11 : vector<8x8x128xf32>
    %cst_9 = arith.constant dense<0.000000e+00> : vector<8x8xf32>
    %13 = vector.multi_reduction <add>, %12, %cst_9 [2] : vector<8x8x128xf32> to vector<8x8xf32>
    %cst_10 = arith.constant dense<0xFF800000> : vector<8xf32>
    %14 = vector.multi_reduction <maximumf>, %13, %cst_10 [1] : vector<8x8xf32> to vector<8xf32>
    %15 = vector.shape_cast %14 : vector<8xf32> to vector<8x1xf32>
    %16 = vector.broadcast %15 : vector<8x1xf32> to vector<8x8xf32>
    %17 = arith.subf %13, %16 : vector<8x8xf32>
    %18 = math.exp %17 : vector<8x8xf32>
    %cst_11 = arith.constant dense<0.000000e+00> : vector<8xf32>
    %19 = vector.multi_reduction <add>, %18, %cst_11 [1] : vector<8x8xf32> to vector<8xf32>
    %20 = vector.shape_cast %19 : vector<8xf32> to vector<8x1xf32>
    %21 = tpu.reciprocal %20 : vector<8x1xf32> -> vector<8x1xf32>
    %22 = vector.broadcast %21 : vector<8x1xf32> to vector<8x8xf32>
    %23 = arith.mulf %18, %22 : vector<8x8xf32>
    %c0_12 = arith.constant 0 : index
    %c0_13 = arith.constant 0 : index
    %24 = vector.load %arg5[%c0_12, %c0_13] : memref<8x8xf32, #tpu.memory_space<vmem>>, vector<8x8xf32>
    tpu.vector_store %arg5[%c0_12, %c0_13], %23 {strides = array<i32>} : memref<8x8xf32, #tpu.memory_space<vmem>>, vector<8x8xf32>,
    return
  }
  func.func @transform_0(%arg0: i32) -> (i32, i32, i32) {
    %c0_i32 = arith.constant 0 : i32
    %c0_i32_0 = arith.constant 0 : i32
    %c0_i32_1 = arith.constant 0 : i32
    return %arg0, %c0_i32, %c0_i32_0 : i32, i32, i32
  }
  func.func @transform_1(%arg0: i32) -> (i32, i32, i32) {
    %c0_i32 = arith.constant 0 : i32
    %c0_i32_0 = arith.constant 0 : i32
    %c0_i32_1 = arith.constant 0 : i32
    return %arg0, %c0_i32, %c0_i32_0 : i32, i32, i32
  }
  func.func @transform_2(%arg0: i32) -> (i32, i32) {
    %c0_i32 = arith.constant 0 : i32
    %c0_i32_0 = arith.constant 0 : i32
    %c0_i32_1 = arith.constant 0 : i32
    return %c0_i32, %c0_i32_0 : i32, i32
  }
  func.func @transform_3(%arg0: i32) -> (i32, i32) {
    %c0_i32 = arith.constant 0 : i32
    %c0_i32_0 = arith.constant 0 : i32
    %c0_i32_1 = arith.constant 0 : i32
    return %c0_i32, %c0_i32_0 : i32, i32
  }
  func.func @transform_4(%arg0: i32) -> (i32, i32) {
    %c0_i32 = arith.constant 0 : i32
    %c0_i32_0 = arith.constant 0 : i32
    return %arg0, %c0_i32 : i32, i32
  }
}

</mosaic_0001>

<bundles_post_ra>
// kernel: tpu_custom_call.1
= control target key start
LH: loop header
LB: loop body
LE: loop exit
PB: predicated region body
PF: predicated region fallthrough
CT: control target
= control target key end

     0   :  { %9 = vsyncpa [#allocation3], 0  ;;  %s1076_s0 = inlined_call_operand.hbm [shape: f32[8,1,128], index: 0, kind: input, shape index: {}]   ;;  %s1077_s1 = inlined_call_operand.hbm [shape: bf16[8,8,128], index: 1, kind: input, shape index: {}]   ;;  %s1078_s2 = inlined_call_operand.hbm [shape: bf16[128,128], index: 2, kind: input, shape index: {}]   ;;  %s1079_s3 = inlined_call_operand.vmem [shape: f32[1,128], index: 3, kind: input, shape index: {}]   ;;  %s1080_s4 = inlined_call_operand.hbm [shape: f32[8,8], index: 4, kind: output, shape index: {}]  }
   0x1   :  { %10 = vsyncpa [#allocation6], 0 }
   0x2   :  { %11 = vsyncpa [#allocation4], 0  ;;  %s888_s15 = smov [#allocation5]   ;;  %s794_s19 = scalar_lea.hbm %s1077_s1, 512 }
   0x3   :  { %s29_s16 = sshll.u32 %s888_s15, 4  ;;  %p795_p0 = scmp.ne.s32.totalorder %s1077_s1, %s794_s19  ;;  %s30_s16 = int_to_ptr.vmem [resolvable:$true] %s29_s16 }
   0x4   :  { %p798_p1 = scmp.lt.u32.totalorder %s794_s19, %s1077_s1 }
   0x6   :  { %p800_p2 = pnand %p798_p1, %p795_p0 }
   0x8   :  { %803 = shalt.err (!%p800_p2)
}
   0x9   :  { %s804_s24 = scalar_lea.vmem %s30_s16, 512  ;;  %p809_p4 = scmp.lt.s32.totalorder %s30_s16, %s30_s16 }
   0xa   :  { %p805_p3 = scmp.ne.s32.totalorder %s30_s16, %s804_s24  ;;  %p810_p5 = scmp.lt.s32.totalorder %s804_s24, %s804_s24 }
   0xc   :  { %p811_p6 = por %p810_p5, %p809_p4 }
   0xe   :  { %p812_p7 = pnand %p811_p6, %p805_p3 }
  0x10   :  { %815 = shalt.err (!%p812_p7)
}
  0x11   :  { %s889_s25 = smov 64   ;;  %s890_s26 = smov 4  }
  0x12   :  { %35 = dma.hbm_to_vmem [thread:$0]  %s1077_s1, 512, %s30_s16, [#allocation6], %s889_s25, %s889_s25, %s890_s26  }
  0x13   :  { %s891_s29 = smov [#allocation2]   ;;  %s816_s7 = scalar_lea.hbm %s1076_s0, 128 }
  0x14   :  { %s17_s30 = sshll.u32 %s891_s29, 4  ;;  %p817_p8 = scmp.ne.s32.totalorder %s1076_s0, %s816_s7  ;;  %s18_s30 = int_to_ptr.vmem [resolvable:$true] %s17_s30 }
  0x15   :  { %p820_p9 = scmp.lt.u32.totalorder %s816_s7, %s1076_s0 }
  0x17   :  { %p822_p10 = pnand %p820_p9, %p817_p8 }
  0x19   :  { %825 = shalt.err (!%p822_p10)
}
  0x1a   :  { %s826_s12 = scalar_lea.vmem %s18_s30, 128  ;;  %p831_p12 = scmp.lt.s32.totalorder %s18_s30, %s18_s30 }
  0x1b   :  { %p827_p11 = scmp.ne.s32.totalorder %s18_s30, %s826_s12  ;;  %p832_p13 = scmp.lt.s32.totalorder %s826_s12, %s826_s12 }
  0x1d   :  { %p833_p0 = por %p832_p13, %p831_p12 }
  0x1f   :  { %p834_p1 = pnand %p833_p0, %p827_p11 }
  0x21   :  { %837 = shalt.err (!%p834_p1)
}
  0x22   :  { %s892_s1 = smov 16   ;;  %s893_s13 = smov 1  }
  0x23   :  { %23 = dma.hbm_to_vmem [thread:$0]  %s1076_s0, 128, %s18_s30, [#allocation3], %s892_s1, %s892_s1, %s893_s13  }
  0x24   :  { %s894_s16 = smov [#allocation7]   ;;  %s838_s20 = scalar_lea.hbm %s1078_s2, 1024 }
  0x25   :  { %s41_s17 = sshll.u32 %s894_s16, 4  ;;  %p839_p2 = scmp.ne.s32.totalorder %s1078_s2, %s838_s20  ;;  %s42_s17 = int_to_ptr.vmem [resolvable:$true] %s41_s17 }
  0x26   :  { %p842_p3 = scmp.lt.u32.totalorder %s838_s20, %s1078_s2 }
  0x28   :  { %p844_p4 = pnand %p842_p3, %p839_p2 }
  0x2a   :  { %847 = shalt.err (!%p844_p4)
}
  0x2b   :  { %s848_s27 = scalar_lea.vmem %s42_s17, 1024  ;;  %p853_p6 = scmp.lt.s32.totalorder %s42_s17, %s42_s17 }
  0x2c   :  { %p849_p5 = scmp.ne.s32.totalorder %s42_s17, %s848_s27  ;;  %p854_p7 = scmp.lt.s32.totalorder %s848_s27, %s848_s27 }
  0x2e   :  { %p855_p8 = por %p854_p7, %p853_p6 }
  0x30   :  { %p856_p9 = pnand %p855_p8, %p849_p5 }
  0x32   :  { %859 = shalt.err (!%p856_p9)
}
  0x33   :  { %47 = dma.hbm_to_vmem [thread:$0]  %s1078_s2, 1024, %s42_s17, [#allocation6], %s889_s25, %s889_s25, %s890_s26  }
  0x34   :  { %882 = dma.done.wait [#allocation3], 128  }
  0x35   :  { %883 = vsyncadd [#allocation3], 4294967168 }
  0x36   :  { %884 = dma.done.wait [#allocation6], 1536  }
  0x37   :  { %885 = vsyncadd [#allocation6], 4294965760  ;;  %v748_v0 = vld [vmem:[#allocation7] sm:$0xff]   ;;  %v749_v1 = vld [vmem:[#allocation7 + $0x8] sm:$0xff]   ;;  %v332_v53 = vlaneseq  ;;  %vm366_vm0 = vcmask 1041409   ;;  %vm368_vm1 = vcmask 1042434  }
  0x38   :  { %697 = vmatprep.subr.bf16.mxu0 %v748_v0  ;;  %721 = vmatprep.subr.bf16.mxu1 %v748_v0  ;;  %v750_v2 = vld [vmem:[#allocation7 + $0x10] sm:$0xff]   ;;  %v751_v3 = vld [vmem:[#allocation7 + $0x18] sm:$0xff]   ;;  %v756_v4 = vld [vmem:[#allocation5] sm:$0xff]   ;;  %vm370_vm2 = vcmask 1043459   ;;  %vm372_vm3 = vcmask 1044484   ;;  %vm374_vm4 = vcmask 1045509  }
  0x39   :  { %698 = vmatpush3.bf16.msra.mxu0 %v748_v0  ;;  %729 = vmatpush3.bf16.msra.mxu1 %v748_v0  ;;  %v758_v5 = vld [vmem:[#allocation5 + $0x10] sm:$0xff]   ;;  %v752_v6 = vld [vmem:[#allocation7 + $0x20] sm:$0xff]   ;;  %v753_v7 = vld [vmem:[#allocation7 + $0x28] sm:$0xff]   ;;  %v333_v54 = vand.u32 127, %v332_v53  ;;  %v967_v55 = vshrl.u32 %v332_v53, 7  ;;  %vm376_vm5 = vcmask 1046534  }
  0x3a   :  { %699 = vmatprep.subr.bf16.mxu0 %v749_v1  ;;  %722 = vmatprep.subr.bf16.mxu1 %v749_v1  ;;  %v754_v8 = vld [vmem:[#allocation7 + $0x30] sm:$0xff]   ;;  %v755_v9 = vld [vmem:[#allocation7 + $0x38] sm:$0xff]   ;;  %v757_v10 = vld [vmem:[#allocation5 + $0x8] sm:$0xff]   ;;  %vm378_vm6 = vcmask 1047559   ;;  %vm381_vm7 = vcmask 64512  }
  0x3b   :  { %713 = vmatprep.mubr.bf16.mxu0 %v756_v4  ;;  %717 = vmatprep.mubr.bf16.mxu1 %v758_v5  ;;  %v759_v11 = vld [vmem:[#allocation5 + $0x18] sm:$0xff]   ;;  %v970_v58 = vsub.s32 %v333_v54, %v967_v55 }
  0x3c   :  { %v678_v12 = vld [vmem:[#allocation2 + $0x2] ss:$0 sm:$0xff]  ;;  %v676_v13 = vld [vmem:[#allocation2] ss:$0 sm:$0xff]  ;;  %v679_v15 = vld [vmem:[#allocation2 + $0x3] ss:$0 sm:$0xff] }
  0x3d   :  { %700 = vmatpush3.bf16.msra.mxu0 %v749_v1  ;;  %730 = vmatpush3.bf16.msra.mxu1 %v749_v1  ;;  %v677_v19 = vld [vmem:[#allocation2 + $0x1] ss:$0 sm:$0xff]  ;;  %v680_v23 = vld [vmem:[#allocation2 + $0x4] ss:$0 sm:$0xff]  ;;  %v681_v28 = vld [vmem:[#allocation2 + $0x5] ss:$0 sm:$0xff] }
  0x3e   :  { %701 = vmatprep.subr.bf16.mxu0 %v750_v2  ;;  %723 = vmatprep.subr.bf16.mxu1 %v750_v2  ;;  %v683_v31 = vld [vmem:[#allocation2 + $0x7] ss:$0 sm:$0xff]  ;;  %v682_v33 = vld [vmem:[#allocation2 + $0x6] ss:$0 sm:$0xff]  ;;  %v684_v36 = vld [vmem:[%s1079_s3] ss:$0 sm:$0xff] }
  0x3f   :  { %s896_s3 = smov [#allocation8]  }
  0x40   :  { %s654_s26 = sshll.u32 %s896_s3, 4  ;;  %s655_s26 = int_to_ptr.vmem [resolvable:$true] %s654_s26 }
  0x41   :  { %702 = vmatpush3.bf16.msra.mxu0 %v750_v2  ;;  %731 = vmatpush3.bf16.msra.mxu1 %v750_v2  ;;  %s860_s29 = scalar_lea.vmem %s655_s26, 128  ;;  %p865_p11 = scmp.lt.s32.totalorder %s655_s26, %s655_s26 }
  0x42   :  { %703 = vmatprep.subr.bf16.mxu0 %v751_v3  ;;  %724 = vmatprep.subr.bf16.mxu1 %v751_v3  ;;  %p861_p10 = scmp.ne.s32.totalorder %s655_s26, %s860_s29  ;;  %p866_p12 = scmp.lt.s32.totalorder %s860_s29, %s860_s29 }
  0x44   :  { %p867_p13 = por %p866_p12, %p865_p11 }
  0x45   :  { %704 = vmatpush3.bf16.msra.mxu0 %v751_v3  ;;  %732 = vmatpush3.bf16.msra.mxu1 %v751_v3 }
  0x46   :  { %705 = vmatprep.subr.bf16.mxu0 %v752_v6  ;;  %725 = vmatprep.subr.bf16.mxu1 %v752_v6  ;;  %p868_p0 = pnand %p867_p13, %p861_p10 }
  0x49   :  { %706 = vmatpush3.bf16.msra.mxu0 %v752_v6  ;;  %733 = vmatpush3.bf16.msra.mxu1 %v752_v6 }
  0x4a   :  { %707 = vmatprep.subr.bf16.mxu0 %v753_v7  ;;  %726 = vmatprep.subr.bf16.mxu1 %v753_v7 }
  0x4d   :  { %708 = vmatpush3.bf16.msra.mxu0 %v753_v7  ;;  %734 = vmatpush3.bf16.msra.mxu1 %v753_v7 }
  0x4e   :  { %709 = vmatprep.subr.bf16.mxu0 %v754_v8  ;;  %727 = vmatprep.subr.bf16.mxu1 %v754_v8 }
  0x51   :  { %710 = vmatpush3.bf16.msra.mxu0 %v754_v8  ;;  %735 = vmatpush3.bf16.msra.mxu1 %v754_v8 }
  0x52   :  { %711 = vmatprep.subr.bf16.mxu0 %v755_v9  ;;  %728 = vmatprep.subr.bf16.mxu1 %v755_v9 }
  0x55   :  { %712 = vmatpush3.bf16.msra.mxu0 %v755_v9  ;;  %736 = vmatpush3.bf16.msra.mxu1 %v755_v9 }
  0x58   :  { %714 = vmatmul.mubr.bf16.vlgmr.msra.gmra.mrb[0].mxu0 %v757_v10  ;;  %718 = vmatmul.mubr.bf16.vlgmr.msra.gmra.mrb[0].mxu1 %v759_v11 }
 0x12b   :  { %v715_v14 = vpop.f32.mrb[0].mxu0  ;;  %v719_v16 = vpop.f32.mrb[0].mxu1 }
 0x12c   :  { %v279_v17 = vadd.f32 %v715_v14, %v678_v12  ;;  %v190_v18 = vpop.f32.mrb[1].mxu0  ;;  %v206_v20 = vpop.f32.mrb[1].mxu1  ;;  %v283_v35 = vadd.f32 %v719_v16, %v682_v33  ;;  %v408_v33 = vsub.s32 5, %v967_v55 }
 0x12d   :  { %v277_v21 = vadd.f32 %v676_v13, %v190_v18  ;;  %v716_v22 = vpop.f32.mrb[2].mxu0  ;;  %v720_v24 = vpop.f32.mrb[2].mxu1  ;;  %v281_v30 = vadd.f32 %v680_v23, %v206_v20  ;;  %v388_v18 = vsub.s32 0, %v967_v55  ;;  %v396_v20 = vsub.s32 2, %v967_v55 }
 0x12e   :  { %760 = vtanh.f32 %v279_v17  ;;  %v280_v25 = vadd.f32 %v716_v22, %v679_v15  ;;  %v193_v26 = vpop.f32.mrb[3].mxu0  ;;  %v209_v27 = vpop.f32.mrb[3].mxu1  ;;  %v284_v34 = vadd.f32 %v720_v24, %v683_v31  ;;  %v895_v17 = vmov 0  }
 0x12f   :  { %762 = vtanh.f32 %v277_v21  ;;  %v278_v29 = vadd.f32 %v677_v19, %v193_v26  ;;  %v282_v32 = vadd.f32 %v681_v28, %v209_v27  ;;  %747 = vset.pattern.permute.xlu0 %v895_v17  ;;  %746 = vset.pattern.permute.xlu1 %v895_v17  ;;  %v392_v19 = vsub.s32 1, %v967_v55 }
 0x130   :  { %764 = vtanh.f32 %v280_v25  ;;  %v400_v21 = vsub.s32 3, %v967_v55  ;;  %v404_v26 = vsub.s32 4, %v967_v55 }
 0x131   :  { %766 = vtanh.f32 %v278_v29 }
 0x132   :  { %768 = vtanh.f32 %v281_v30 }
 0x133   :  { %770 = vtanh.f32 %v282_v32 }
 0x134   :  { %772 = vtanh.f32 %v284_v34 }
 0x135   :  { %774 = vtanh.f32 %v283_v35 }
 0x138   :  { %v761_v37 = vpop.eup %760 }
 0x139   :  { %v763_v38 = vpop.eup %762  ;;  %v302_v39 = vmul.f32 %v761_v37, %v684_v36  ;;  %v412_v37 = vsub.s32 6, %v967_v55 }
 0x13a   :  { %v765_v40 = vpop.eup %764  ;;  %v300_v41 = vmul.f32 %v763_v38, %v684_v36 }
 0x13b   :  { %v767_v42 = vpop.eup %766  ;;  %312 = vadd.xlane.f32.xlu1 %v302_v39  ;;  %v303_v43 = vmul.f32 %v765_v40, %v684_v36 }
 0x13c   :  { %308 = vadd.xlane.f32.xlu0 %v300_v41  ;;  %v769_v44 = vpop.eup %768  ;;  %v301_v45 = vmul.f32 %v767_v42, %v684_v36  ;;  %v416_v41 = vsub.s32 7, %v967_v55 }
 0x13d   :  { %v771_v46 = vpop.eup %770  ;;  %v304_v49 = vmul.f32 %v769_v44, %v684_v36 }
 0x13e   :  { %v305_v47 = vmul.f32 %v771_v46, %v684_v36  ;;  %v773_v48 = vpop.eup %772 }
 0x13f   :  { %314 = vadd.xlane.f32.xlu1 %v303_v43  ;;  %v775_v50 = vpop.eup %774  ;;  %v307_v51 = vmul.f32 %v773_v48, %v684_v36 }
 0x140   :  { %310 = vadd.xlane.f32.xlu0 %v301_v45  ;;  %v306_v52 = vmul.f32 %v775_v50, %v684_v36 }
 0x143   :  { %318 = vadd.xlane.f32.xlu1 %v305_v47 }
 0x144   :  { %316 = vadd.xlane.f32.xlu0 %v304_v49 }
 0x147   :  { %322 = vadd.xlane.f32.xlu1 %v307_v51 }
 0x148   :  { %320 = vadd.xlane.f32.xlu0 %v306_v52 }
 0x1c8   :  { %v313_v56 = vpop.xlane.xlu1 %312 }
 0x1c9   :  { %v309_v57 = vpop.xlane.xlu0 %308  ;;  %v345_v63 = vrot.slane %v313_v56, %v970_v58 }
 0x1ca   :  { %v337_v61 = vrot.slane %v309_v57, %v970_v58 }
 0x1cc   :  { %v315_v59 = vpop.xlane.xlu1 %314 }
 0x1cd   :  { %v311_v60 = vpop.xlane.xlu0 %310  ;;  %v349_v0 = vrot.slane %v315_v59, %v970_v58 }
 0x1ce   :  { %v341_v62 = vrot.slane %v311_v60, %v970_v58 }
 0x1d0   :  { %v367_v1 = vsel %vm366_vm0, %v341_v62, %v337_v61  ;;  %v319_v2 = vpop.xlane.xlu1 %318 }
 0x1d1   :  { %v369_v3 = vsel %vm368_vm1, %v345_v63, %v367_v1  ;;  %v317_v4 = vpop.xlane.xlu0 %316  ;;  %v357_v9 = vrot.slane %v319_v2, %v970_v58 }
 0x1d2   :  { %v371_v5 = vsel %vm370_vm2, %v349_v0, %v369_v3  ;;  %v353_v6 = vrot.slane %v317_v4, %v970_v58 }
 0x1d4   :  { %v373_v7 = vsel %vm372_vm3, %v353_v6, %v371_v5  ;;  %v981_v8 = vpop.xlane.xlu1 %322 }
 0x1d5   :  { %v321_v10 = vpop.xlane.xlu0 %320  ;;  %v365_v12 = vrot.slane %v981_v8, %v970_v58  ;;  %v375_v13 = vsel %vm374_vm4, %v357_v9, %v373_v7 }
 0x1d6   :  { %v361_v11 = vrot.slane %v321_v10, %v970_v58 }
 0x1d8   :  { %v377_v14 = vsel %vm376_vm5, %v361_v11, %v375_v13 }
 0x1d9   :  { %v379_v15 = vsel %vm378_vm6, %v365_v12, %v377_v14 }
 0x1da   :  { %v382_v16 = vsel %vm381_vm7, %v379_v15, -inf }
 0x1db   :  { %383 = vmax.xlane.f32.xlu0 %v382_v16 }
 0x268   :  { %v384_v22 = vpop.xlane.xlu0 %383 }
 0x269   :  { %v389_v23 = vrot.slane %v384_v22, %v388_v18  ;;  %v393_v24 = vrot.slane %v384_v22, %v392_v19  ;;  %v397_v25 = vrot.slane %v384_v22, %v396_v20  ;;  %v401_v27 = vrot.slane %v384_v22, %v400_v21 }
 0x26a   :  { %v405_v34 = vrot.slane %v384_v22, %v404_v26  ;;  %v409_v38 = vrot.slane %v384_v22, %v408_v33  ;;  %v413_v42 = vrot.slane %v384_v22, %v412_v37  ;;  %v417_v47 = vrot.slane %v384_v22, %v416_v41 }
 0x26b   :  { %v426_v28 = vsub.f32 %v309_v57, %v389_v23  ;;  %v427_v29 = vsub.f32 %v311_v60, %v393_v24  ;;  %v428_v30 = vsub.f32 %v313_v56, %v397_v25  ;;  %v429_v35 = vsub.f32 %v315_v59, %v401_v27 }
 0x26c   :  { %v430_v39 = vsub.f32 %v317_v4, %v405_v34  ;;  %v431_v43 = vsub.f32 %v319_v2, %v409_v38  ;;  %v432_v48 = vsub.f32 %v321_v10, %v413_v42  ;;  %v433_v51 = vsub.f32 %v981_v8, %v417_v47 }
 0x26d   :  { %v434_v31 = vmul.f32 1.442695, %v426_v28  ;;  %v436_v32 = vmul.f32 1.442695, %v427_v29  ;;  %v438_v36 = vmul.f32 1.442695, %v428_v30 }
 0x26e   :  { %v440_v40 = vmul.f32 1.442695, %v429_v35  ;;  %v442_v44 = vmul.f32 1.442695, %v430_v39  ;;  %v444_v49 = vmul.f32 1.442695, %v431_v43 }
 0x26f   :  { %776 = vpow2.f32 %v434_v31  ;;  %v446_v52 = vmul.f32 1.442695, %v432_v48  ;;  %v448_v54 = vmul.f32 1.442695, %v433_v51 }
 0x270   :  { %778 = vpow2.f32 %v436_v32 }
 0x271   :  { %780 = vpow2.f32 %v438_v36 }
 0x272   :  { %782 = vpow2.f32 %v440_v40 }
 0x273   :  { %784 = vpow2.f32 %v442_v44 }
 0x274   :  { %786 = vpow2.f32 %v444_v49 }
 0x275   :  { %788 = vpow2.f32 %v446_v52 }
 0x276   :  { %790 = vpow2.f32 %v448_v54 }
 0x279   :  { %v777_v45 = vpop.eup %776 }
 0x27a   :  { %v779_v46 = vpop.eup %778  ;;  %459 = vperm.xlu1 %746, %v777_v45  }
 0x27b   :  { %462 = vperm.xlu0 %747, %v779_v46   ;;  %v781_v50 = vpop.eup %780 }
 0x27c   :  { %v783_v53 = vpop.eup %782 }
 0x27d   :  { %v785_v56 = vpop.eup %784 }
 0x27e   :  { %465 = vperm.xlu1 %746, %v781_v50   ;;  %v787_v57 = vpop.eup %786 }
 0x27f   :  { %v789_v59 = vpop.eup %788 }
 0x280   :  { %v791_v60 = vpop.eup %790 }
 0x282   :  { %468 = vperm.xlu1 %746, %v783_v53  }
 0x286   :  { %471 = vperm.xlu1 %746, %v785_v56  }
 0x28a   :  { %474 = vperm.xlu1 %746, %v787_v57  }
 0x28e   :  { %477 = vperm.xlu1 %746, %v789_v59  }
 0x292   :  { %480 = vperm.xlu1 %746, %v791_v60  }
 0x2f9   :  { %v460_v61 = vpop.permute.xlu1 %459 }
 0x2fa   :  { %v463_v1 = vpop.permute.xlu0 %462  ;;  %v485_v4 = vrot.slane %v460_v61, %v970_v58 }
 0x2fb   :  { %v489_v3 = vrot.slane %v463_v1, %v970_v58 }
 0x2fd   :  { %v466_v62 = vpop.permute.xlu1 %465  ;;  %v514_v9 = vsel %vm366_vm0, %v489_v3, %v485_v4 }
 0x2fe   :  { %v493_v5 = vrot.slane %v466_v62, %v970_v58 }
 0x300   :  { %v515_v11 = vsel %vm368_vm1, %v493_v5, %v514_v9 }
 0x301   :  { %v469_v63 = vpop.permute.xlu1 %468 }
 0x302   :  { %v497_v6 = vrot.slane %v469_v63, %v970_v58 }
 0x304   :  { %v516_v13 = vsel %vm370_vm2, %v497_v6, %v515_v11 }
 0x305   :  { %v472_v0 = vpop.permute.xlu1 %471 }
 0x306   :  { %v501_v7 = vrot.slane %v472_v0, %v970_v58 }
 0x308   :  { %v517_v14 = vsel %vm372_vm3, %v501_v7, %v516_v13 }
 0x309   :  { %v475_v2 = vpop.permute.xlu1 %474 }
 0x30a   :  { %v505_v10 = vrot.slane %v475_v2, %v970_v58 }
 0x30c   :  { %v518_v16 = vsel %vm374_vm4, %v505_v10, %v517_v14 }
 0x30d   :  { %v478_v8 = vpop.permute.xlu1 %477 }
 0x30e   :  { %v509_v12 = vrot.slane %v478_v8, %v970_v58 }
 0x310   :  { %v519_v22 = vsel %vm376_vm5, %v509_v12, %v518_v16 }
 0x311   :  { %v481_v15 = vpop.permute.xlu1 %480 }
 0x312   :  { %v513_v17 = vrot.slane %v481_v15, %v970_v58 }
 0x314   :  { %v520_v23 = vsel %vm378_vm6, %v513_v17, %v519_v22 }
 0x315   :  { %v522_v24 = vsel %vm381_vm7, %v520_v23, 0.0 }
 0x316   :  { %523 = vadd.xlane.f32.xlu1 %v522_v24 }
 0x3a3   :  { %v524_v25 = vpop.xlane.xlu1 %523 }
 0x3a4   :  { %792 = vrcp.f32 %v524_v25 }
 0x3ae   :  { %v793_v27 = vpop.eup %792 }
 0x3af   :  { %v530_v28 = vrot.slane %v793_v27, %v388_v18  ;;  %v534_v30 = vrot.slane %v793_v27, %v392_v19  ;;  %v538_v32 = vrot.slane %v793_v27, %v396_v20  ;;  %v542_v35 = vrot.slane %v793_v27, %v400_v21 }
 0x3b0   :  { %v546_v38 = vrot.slane %v793_v27, %v404_v26  ;;  %v550_v19 = vrot.slane %v793_v27, %v408_v33  ;;  %v554_v20 = vrot.slane %v793_v27, %v412_v37  ;;  %v558_v21 = vrot.slane %v793_v27, %v416_v41 }
 0x3b1   :  { %v567_v29 = vmul.f32 %v777_v45, %v530_v28  ;;  %v568_v31 = vmul.f32 %v779_v46, %v534_v30  ;;  %v569_v34 = vmul.f32 %v781_v50, %v538_v32  ;;  %v570_v36 = vmul.f32 %v783_v53, %v542_v35 }
 0x3b2   :  { %v571_v18 = vmul.f32 %v785_v56, %v546_v38  ;;  %v572_v39 = vmul.f32 %v787_v57, %v550_v19  ;;  %v573_v40 = vmul.f32 %v789_v59, %v554_v20  ;;  %v574_v42 = vmul.f32 %v791_v60, %v558_v21 }
 0x3b3   :  { %584 = vperm.xlu0 %747, %v567_v29  }
 0x3b7   :  { %587 = vperm.xlu0 %747, %v568_v31  }
 0x3bb   :  { %590 = vperm.xlu0 %747, %v569_v34  }
 0x3bf   :  { %593 = vperm.xlu0 %747, %v570_v36  }
 0x3c3   :  { %596 = vperm.xlu0 %747, %v571_v18  }
 0x3c7   :  { %599 = vperm.xlu0 %747, %v572_v39  }
 0x3cb   :  { %602 = vperm.xlu0 %747, %v573_v40  }
 0x3cf   :  { %605 = vperm.xlu0 %747, %v574_v42  }
 0x432   :  { %v585_v43 = vpop.permute.xlu0 %584 }
 0x433   :  { %v610_v37 = vrot.slane %v585_v43, %v970_v58 }
 0x436   :  { %v588_v26 = vpop.permute.xlu0 %587 }
 0x437   :  { %v614_v33 = vrot.slane %v588_v26, %v970_v58 }
 0x439   :  { %v639_v50 = vsel %vm366_vm0, %v614_v33, %v610_v37 }
 0x43a   :  { %v591_v44 = vpop.permute.xlu0 %590 }
 0x43b   :  { %v618_v48 = vrot.slane %v591_v44, %v970_v58 }
 0x43d   :  { %v640_v52 = vsel %vm368_vm1, %v618_v48, %v639_v50 }
 0x43e   :  { %v594_v45 = vpop.permute.xlu0 %593 }
 0x43f   :  { %v622_v49 = vrot.slane %v594_v45, %v970_v58 }
 0x441   :  { %v641_v54 = vsel %vm370_vm2, %v622_v49, %v640_v52 }
 0x442   :  { %v597_v46 = vpop.permute.xlu0 %596 }
 0x443   :  { %v626_v55 = vrot.slane %v597_v46, %v970_v58 }
 0x445   :  { %v642_v56 = vsel %vm372_vm3, %v626_v55, %v641_v54 }
 0x446   :  { %v600_v47 = vpop.permute.xlu0 %599 }
 0x447   :  { %v630_v51 = vrot.slane %v600_v47, %v970_v58 }
 0x449   :  { %v643_v59 = vsel %vm374_vm4, %v630_v51, %v642_v56 }
 0x44a   :  { %v603_v41 = vpop.permute.xlu0 %602 }
 0x44b   :  { %v634_v53 = vrot.slane %v603_v41, %v970_v58 }
 0x44d   :  { %v644_v61 = vsel %vm376_vm5, %v634_v53, %v643_v59 }
 0x44e   :  { %v606_v57 = vpop.permute.xlu0 %605 }
 0x44f   :  { %v638_v60 = vrot.slane %v606_v57, %v970_v58 }
 0x451   :  { %v645_v62 = vsel %vm378_vm6, %v638_v60, %v644_v61 }
 0x452   :  { %647 = vst.msk [vmem:[#allocation8] sm:$0xff] %vm381_vm7, %v645_v62 }
 0x453   :  { %871 = shalt.err (!%p868_p0)
}
 0x454   :  { %s872_s6 = scalar_lea.hbm %s1080_s4, 128 }
 0x455   :  { %p873_p1 = scmp.ne.s32.totalorder %s1080_s4, %s872_s6  ;;  %p876_p2 = scmp.lt.u32.totalorder %s872_s6, %s1080_s4 }
 0x457   :  { %p878_p3 = pnand %p876_p2, %p873_p1 }
 0x459   :  { %881 = shalt.err (!%p878_p3)
}
 0x45a   :  { %657 = dma.vmem_to_hbm [thread:$0]  %s655_s26, 128, %s1080_s4, [#allocation4]  }
 0x45b   :  { %886 = dma.done.wait [#allocation4], 128  }
 0x45c   :  { %887 = vsyncadd [#allocation4], 4294967168 }
 0x45d   :  { %661 = vsyncpa [#allocation3], 1 }
 0x45e   :  { %662 = vsyncpa [#allocation6], 1 }
 0x45f   :  { %663 = vsyncpa [#allocation4], 1 }

</bundles_post_ra>
